<compile_context>
chip_gen: v7x
topology: tpu7x:2x2x1
jax: 0.10.0
libtpu: 0.0.40
codegen_flags: <defaults>
</compile_context>

<pallas_src>
import functools
import math

import jax
import jax.numpy as jnp
from jax.experimental import pallas as pl
from jax.experimental.pallas import tpu as pltpu


DEFAULT_COMPUTE_DTYPE = jnp.bfloat16
_VMEM_LIMIT_BYTES = 32 * 1024 * 1024    # safe on v5e/v6e (128 MiB) and v7x (64 MiB)
_FUSED_VMEM_BUDGET = 24 * 1024 * 1024   # headroom under the scoped limit


def _round_up(x, m):
    return ((x + m - 1) // m) * m


def _cdiv(a, b):
    return -(-a // b)


def _choose_tile(dim, max_tile, align):
    """Balanced tile: <= max_tile, multiple of `align`, minimal padding waste."""
    dim_a = _round_up(max(dim, 1), align)
    if dim_a <= max_tile:
        return dim_a
    n_blocks = _cdiv(dim_a, max_tile)
    return _round_up(_cdiv(dim_a, n_blocks), align)


def _default_tiles():
    """Generation-aware default tiles for the tiled (fallback) matmul path."""
    kind = ""
    try:
        kind = jax.devices()[0].device_kind.lower()
    except Exception:
        pass
    if "v6" in kind or "v7" in kind:
        # Higher HBM BW / MXU throughput: 1024-wide output tiles reach the
        # compute roofline; ~12 MiB VMEM w/ double-buffering fits v7x's limit.
        return 1024, 1024, 512
    # v5e (and unknown): 512^3 bf16 is already MXU-bound; keep VMEM modest.
    return 512, 512, 512


# ----------------------------------------------------------------------------
# Fused FFN kernel (weights resident in VMEM, h never leaves VMEM)
# ----------------------------------------------------------------------------
def _ffn_fused_kernel(x_ref, w1_ref, b1_ref, w2_ref, b2_ref, o_ref, *,
                      compute_dtype):
    h = jnp.dot(x_ref[...], w1_ref[...], preferred_element_type=jnp.float32)
    h = jnp.maximum(h + b1_ref[...].astype(jnp.float32), 0.0)
    # TODO(synk): training-mode dropout (dropout_r > 0) would mask `h` here via
    # pltpu.prng_seed + pltpu.prng_random_bits.
    h = h.astype(compute_dtype)
    y = jnp.dot(h, w2_ref[...], preferred_element_type=jnp.float32)
    o_ref[...] = (y + b2_ref[...].astype(jnp.float32)).astype(o_ref.dtype)


def _fused_vmem_bytes(tm, Kp, Fp, Np, compute_dtype, out_dtype):
    cs = jnp.dtype(compute_dtype).itemsize
    os_ = jnp.dtype(out_dtype).itemsize
    weights = 2 * (Kp * Fp + Fp * Np) * cs + 2 * (Fp + Np) * 4  # double-buffered
    io = 2 * tm * Kp * cs + 2 * tm * Np * os_
    h_tmp = tm * Fp * (4 + cs)   # f32 h + compute-dtype copy
    return weights + io + h_tmp


# ----------------------------------------------------------------------------
# Tiled linear kernel (fallback for weights that do not fit VMEM)
# ----------------------------------------------------------------------------
def _linear_kernel(x_ref, w_ref, b_ref, o_ref, acc_ref, *, use_relu):
    """One (i, j, k) grid step of y = act(x @ w + b)."""
    k = pl.program_id(2)

    @pl.when(k == 0)
    def _():
        acc_ref[...] = jnp.zeros_like(acc_ref)

    acc_ref[...] += jnp.dot(
        x_ref[...], w_ref[...], preferred_element_type=jnp.float32
    )

    @pl.when(k == pl.num_programs(2) - 1)
    def _():
        y = acc_ref[...] + b_ref[...].astype(jnp.float32)
        if use_relu:
            y = jnp.maximum(y, 0.0)
        o_ref[...] = y.astype(o_ref.dtype)


def linear_pallas(x2, w, b, *, use_relu, out_dtype, tile_m, tile_n, tile_k):
    """y[M, N] = act(x2[M, K] @ w[K, N] + b[N]); x2/w already in compute dtype."""
    M, K = x2.shape
    Kw, N = w.shape
    assert K == Kw, "weight in_size mismatch"

    tm = _choose_tile(M, tile_m, 16)
    tn = _choose_tile(N, tile_n, 128)
    tk = _choose_tile(K, tile_k, 128)
    Mp, Np, Kp = _round_up(M, tm), _round_up(N, tn), _round_up(K, tk)

    if (Mp, Kp) != (M, K):
        x2 = jnp.pad(x2, ((0, Mp - M), (0, Kp - K)))
    if (Kp, Np) != (K, N):   # no-op for pre-padded weights at typical sizes
        w = jnp.pad(w, ((0, Kp - K), (0, Np - N)))
    b2 = b.reshape(1, N)
    if Np != N:
        b2 = jnp.pad(b2, ((0, 0), (0, Np - N)))

    grid = (Mp // tm, Np // tn, Kp // tk)

    cost = pl.CostEstimate(
        flops=2 * Mp * Kp * Np,
        transcendentals=0,
        bytes_accessed=(Mp * Kp + Kp * Np) * jnp.dtype(x2.dtype).itemsize
        + Mp * Np * jnp.dtype(out_dtype).itemsize,
    )

    out = pl.pallas_call(
        functools.partial(_linear_kernel, use_relu=use_relu),
        out_shape=jax.ShapeDtypeStruct((Mp, Np), out_dtype),
        grid_spec=pltpu.PrefetchScalarGridSpec(
            num_scalar_prefetch=0,
            grid=grid,
            in_specs=[
                pl.BlockSpec((tm, tk), lambda i, j, k: (i, k)),   # x tile
                pl.BlockSpec((tk, tn), lambda i, j, k: (k, j)),   # w tile
                pl.BlockSpec((1, tn), lambda i, j, k: (0, j)),    # bias tile
            ],
            out_specs=pl.BlockSpec((tm, tn), lambda i, j, k: (i, j)),
            scratch_shapes=[pltpu.VMEM((tm, tn), jnp.float32)],
        ),
        compiler_params=pltpu.CompilerParams(
            dimension_semantics=("parallel", "parallel", "arbitrary"),
            vmem_limit_bytes=_VMEM_LIMIT_BYTES,
        ),
        cost_estimate=cost,
    )(x2, w, b2)

    if (Mp, Np) != (M, N):
        out = out[:M, :N]
    return out


# ----------------------------------------------------------------------------
# Parameter preparation (pad + cast ONCE, not per forward)
# ----------------------------------------------------------------------------
def prepare_ffn_params(w1, b1, w2, b2, *, compute_dtype=DEFAULT_COMPUTE_DTYPE):
    """Pad weights/biases to 128-multiples and cast weights to the compute dtype.

    Weights are stored as (in_size, out_size) == torch nn.Linear (out, in)
    transposed, so the MXU sees plain [M,K]x[K,N] matmuls. Biases stay f32
    (they are added to the f32 accumulator in the epilogue).
    """
    K, F = w1.shape
    F2, N = w2.shape
    assert F == F2, "MLP mid_size mismatch"
    assert b1.shape == (F,) and b2.shape == (N,)
    Kp, Fp, Np = _round_up(K, 128), _round_up(F, 128), _round_up(N, 128)
    w1p = jnp.pad(w1, ((0, Kp - K), (0, Fp - F))).astype(compute_dtype)
    w2p = jnp.pad(w2, ((0, Fp - F), (0, Np - N))).astype(compute_dtype)
    b1p = jnp.pad(b1, (0, Fp - F)).astype(jnp.float32).reshape(1, Fp)
    b2p = jnp.pad(b2, (0, Np - N)).astype(jnp.float32).reshape(1, Np)
    return dict(w1=w1p, b1=b1p, w2=w2p, b2=b2p,
                in_size=K, ff=F, out_size=N, compute_dtype=compute_dtype)


# ----------------------------------------------------------------------------
# FFN forward
# ----------------------------------------------------------------------------
def ffn_forward(x, params, *, dropout_r=0.0, training=False,
                tile_m=None, tile_n=None, tile_k=None, force_fallback=False):
    """FFN.forward: Linear(hidden->ff) -> ReLU -> [Dropout] -> Linear(ff->hidden)."""
    # Eval-mode / dropout_r==0 dropout is the identity; training-mode dropout is
    # not implemented in-kernel -> fail loudly rather than silently ignoring it.
    assert not (training and dropout_r > 0.0), (
        "training-mode dropout not implemented in the Pallas kernel")

    dm, dn, dk = _default_tiles()
    tile_m = dm if tile_m is None else tile_m
    tile_n = dn if tile_n is None else tile_n
    tile_k = dk if tile_k is None else tile_k

    lead = x.shape[:-1]
    in_size = x.shape[-1]
    assert in_size == params["in_size"], "input feature size mismatch"
    out_dtype = x.dtype
    cdtype = params["compute_dtype"]
    out_size = params["out_size"]

    M = math.prod(lead) if lead else 1
    x2 = x.reshape(M, in_size)

    w1p, b1p, w2p, b2p = params["w1"], params["b1"], params["w2"], params["b2"]
    Kp, Fp = w1p.shape
    _, Np = w2p.shape

    # Cast activations to the compute dtype and pad K (weights already padded).
    x2 = x2.astype(cdtype)
    if Kp != in_size:
        x2 = jnp.pad(x2, ((0, 0), (0, Kp - in_size)))

    # Fused path holds both weight matrices resident in VMEM, so a bigger row
    # tile only trims grid overhead; cap at 512 to keep VMEM modest on v7x.
    tm = _choose_tile(M, min(tile_m, 512), 16)
    Mp = _round_up(M, tm)

    use_fused = (not force_fallback) and (
        _fused_vmem_bytes(tm, Kp, Fp, Np, cdtype, out_dtype) <= _FUSED_VMEM_BUDGET)

    if use_fused:
        if Mp != M:
            x2 = jnp.pad(x2, ((0, Mp - M), (0, 0)))
        cost = pl.CostEstimate(
            flops=2 * Mp * Kp * Fp + 2 * Mp * Fp * Np,
            transcendentals=0,
            bytes_accessed=(Mp * Kp + Kp * Fp + Fp * Np) * jnp.dtype(cdtype).itemsize
            + Mp * Np * jnp.dtype(out_dtype).itemsize,
        )
        out = pl.pallas_call(
            functools.partial(_ffn_fused_kernel, compute_dtype=cdtype),
            out_shape=jax.ShapeDtypeStruct((Mp, Np), out_dtype),
            grid_spec=pltpu.PrefetchScalarGridSpec(
                num_scalar_prefetch=0,
                grid=(Mp // tm,),
                in_specs=[
                    pl.BlockSpec((tm, Kp), lambda i: (i, 0)),   # x rows
                    pl.BlockSpec((Kp, Fp), lambda i: (0, 0)),   # W1 (VMEM-resident)
                    pl.BlockSpec((1, Fp), lambda i: (0, 0)),    # b1
                    pl.BlockSpec((Fp, Np), lambda i: (0, 0)),   # W2 (VMEM-resident)
                    pl.BlockSpec((1, Np), lambda i: (0, 0)),    # b2
                ],
                out_specs=pl.BlockSpec((tm, Np), lambda i: (i, 0)),
            ),
            compiler_params=pltpu.CompilerParams(
                dimension_semantics=("parallel",),
                vmem_limit_bytes=_VMEM_LIMIT_BYTES,
            ),
            cost_estimate=cost,
        )(x2, w1p, b1p, w2p, b2p)
        out = out[:M, :out_size]
    else:
        # Fallback: two tiled matmuls; intermediate stays in the compute dtype
        # (bf16) so its HBM round-trip costs half the bytes.
        h = linear_pallas(x2, w1p, b1p, use_relu=True, out_dtype=cdtype,
                          tile_m=tile_m, tile_n=tile_n, tile_k=tile_k)
        y = linear_pallas(h, w2p, b2p, use_relu=False, out_dtype=out_dtype,
                          tile_m=tile_m, tile_n=tile_n, tile_k=tile_k)
        out = y[:, :out_size]

    return out.reshape(*lead, out_size)


def init_linear_params(key, in_size, out_size, dtype=jnp.float32):
    """Deterministic init mimicking nn.Linear (uniform +-1/sqrt(in_size)).

    Weight stored as (in_size, out_size) == torch weight (out, in) transposed.
    """
    kw, kb = jax.random.split(key)
    bound = 1.0 / (in_size ** 0.5)
    w = jax.random.uniform(kw, (in_size, out_size), dtype, -bound, bound)
    b = jax.random.uniform(kb, (out_size,), dtype, -bound, bound)
    return w, b


if __name__ == "__main__":
    key = jax.random.PRNGKey(0)
    kx, k1, k2 = jax.random.split(key, 3)

    # Small shapes consistent with FFN (hidden -> ff_dim -> hidden).
    batch, seq, hidden, ff_dim = 2, 7, 128, 256    # M=14 exercises row padding
    x = jax.random.normal(kx, (batch, seq, hidden), dtype=jnp.float32)
    w1, b1 = init_linear_params(k1, hidden, ff_dim)
    w2, b2 = init_linear_params(k2, ff_dim, hidden)

    params = prepare_ffn_params(w1, b1, w2, b2)    # pad + bf16 cast, once

    # Fused weight-resident path (primary).
    y_fused = jax.block_until_ready(
        ffn_forward(x, params, dropout_r=0.1, training=False))
    # Tiled two-matmul fallback path (forced, to exercise both kernels).
    y_tiled = jax.block_until_ready(
        ffn_forward(x, params, dropout_r=0.1, training=False,
                    force_fallback=True))

    # Plain-JAX f32 reference (Linear -> ReLU -> Linear; eval-mode dropout = id).
    ref = jnp.maximum(x @ w1 + b1, 0.0) @ w2 + b2

    assert y_fused.shape == (batch, seq, hidden)
    assert y_fused.dtype == x.dtype
    err_fused = float(jnp.max(jnp.abs(y_fused - ref)))
    err_tiled = float(jnp.max(jnp.abs(y_tiled - ref)))
    # bf16 compute (with f32 accumulation) vs f32 reference -> loosened tolerance.
    assert err_fused < 5e-2, f"fused path max abs err {err_fused}"
    assert err_tiled < 5e-2, f"tiled path max abs err {err_tiled}"
    assert jnp.allclose(y_fused, y_tiled, atol=1e-3, rtol=1e-3), (
        float(jnp.max(jnp.abs(y_fused - y_tiled))))

    print("KERNEL_OK")
</pallas_src>

<mosaic_0001>
module attributes {stable_mosaic.version = 11 : i64} {
  func.func @_ffn_fused_kernel(%arg0: i32, %arg1: memref<16x128xbf16, #tpu.memory_space<vmem>>, %arg2: memref<128x256xbf16, #tpu.memory_space<vmem>>, %arg3: memref<1x256xf32, #tpu.memory_space<vmem>>, %arg4: memref<256x128xbf16, #tpu.memory_space<vmem>>, %arg5: memref<1x128xf32, #tpu.memory_space<vmem>>, %arg6: memref<16x128xf32, #tpu.memory_space<vmem>>) attributes {dimension_semantics = [#tpu.dimension_semantics<parallel>], iteration_bounds = array<i64: 1>, scalar_prefetch = 0 : i64, scratch_operands = 0 : i64, tpu.core_type = #tpu.core_type<tc>, window_params = [{transform_indices = @transform_0, window_bounds = array<i64: 16, 128>}, {pipeline_mode = #tpu.pipeline_mode<synchronous>, transform_indices = @transform_1, window_bounds = array<i64: 128, 256>}, {pipeline_mode = #tpu.pipeline_mode<synchronous>, transform_indices = @transform_2, window_bounds = array<i64: 1, 256>}, {pipeline_mode = #tpu.pipeline_mode<synchronous>, transform_indices = @transform_3, window_bounds = array<i64: 256, 128>}, {pipeline_mode = #tpu.pipeline_mode<synchronous>, transform_indices = @transform_4, window_bounds = array<i64: 1, 128>}, {transform_indices = @transform_5, window_bounds = array<i64: 16, 128>}]} {
    %c0 = arith.constant 0 : index
    %c0_0 = arith.constant 0 : index
    %0 = vector.load %arg1[%c0, %c0_0] : memref<16x128xbf16, #tpu.memory_space<vmem>>, vector<16x128xbf16>
    %c0_1 = arith.constant 0 : index
    %c0_2 = arith.constant 0 : index
    %1 = vector.load %arg2[%c0_1, %c0_2] : memref<128x256xbf16, #tpu.memory_space<vmem>>, vector<128x256xbf16>
    %cst = arith.constant dense<0.000000e+00> : vector<16x256xf32>
    %2 = tpu.matmul %0, %1, %cst {dimension_numbers = #tpu.dot_dimension_numbers<[1], [0], [0], [1], [0, 0, 1, 1], [], []>} : vector<16x128xbf16>, vector<128x256xbf16>, vector<16x256xf32> -> vector<16x256xf32>
    %c0_3 = arith.constant 0 : index
    %c0_4 = arith.constant 0 : index
    %3 = vector.load %arg3[%c0_3, %c0_4] : memref<1x256xf32, #tpu.memory_space<vmem>>, vector<1x256xf32>
    %4 = vector.broadcast %3 : vector<1x256xf32> to vector<16x256xf32>
    %5 = arith.addf %2, %4 : vector<16x256xf32>
    %cst_5 = arith.constant 0.000000e+00 : f32
    %6 = vector.broadcast %cst_5 : f32 to vector<16x256xf32>
    %7 = arith.maximumf %5, %6 : vector<16x256xf32>
    %8 = arith.truncf %7 : vector<16x256xf32> to vector<16x256xbf16>
    %c0_6 = arith.constant 0 : index
    %c0_7 = arith.constant 0 : index
    %9 = vector.load %arg4[%c0_6, %c0_7] : memref<256x128xbf16, #tpu.memory_space<vmem>>, vector<256x128xbf16>
    %cst_8 = arith.constant dense<0.000000e+00> : vector<16x128xf32>
    %10 = tpu.matmul %8, %9, %cst_8 {dimension_numbers = #tpu.dot_dimension_numbers<[1], [0], [0], [1], [0, 0, 1, 1], [], []>} : vector<16x256xbf16>, vector<256x128xbf16>, vector<16x128xf32> -> vector<16x128xf32>
    %c0_9 = arith.constant 0 : index
    %c0_10 = arith.constant 0 : index
    %11 = vector.load %arg5[%c0_9, %c0_10] : memref<1x128xf32, #tpu.memory_space<vmem>>, vector<1x128xf32>
    %12 = vector.broadcast %11 : vector<1x128xf32> to vector<16x128xf32>
    %13 = arith.addf %10, %12 : vector<16x128xf32>
    %c0_11 = arith.constant 0 : index
    %c0_12 = arith.constant 0 : index
    %14 = vector.load %arg6[%c0_11, %c0_12] : memref<16x128xf32, #tpu.memory_space<vmem>>, vector<16x128xf32>
    tpu.vector_store %arg6[%c0_11, %c0_12], %13 {strides = array<i32>} : memref<16x128xf32, #tpu.memory_space<vmem>>, vector<16x128xf32>,
    return
  }
  func.func @transform_0(%arg0: i32) -> (i32, i32) {
    %c0_i32 = arith.constant 0 : i32
    %c0_i32_0 = arith.constant 0 : i32
    return %arg0, %c0_i32 : i32, i32
  }
  func.func @transform_1(%arg0: i32) -> (i32, i32) {
    %c0_i32 = arith.constant 0 : i32
    %c0_i32_0 = arith.constant 0 : i32
    %c0_i32_1 = arith.constant 0 : i32
    return %c0_i32, %c0_i32_0 : i32, i32
  }
  func.func @transform_2(%arg0: i32) -> (i32, i32) {
    %c0_i32 = arith.constant 0 : i32
    %c0_i32_0 = arith.constant 0 : i32
    %c0_i32_1 = arith.constant 0 : i32
    return %c0_i32, %c0_i32_0 : i32, i32
  }
  func.func @transform_3(%arg0: i32) -> (i32, i32) {
    %c0_i32 = arith.constant 0 : i32
    %c0_i32_0 = arith.constant 0 : i32
    %c0_i32_1 = arith.constant 0 : i32
    return %c0_i32, %c0_i32_0 : i32, i32
  }
  func.func @transform_4(%arg0: i32) -> (i32, i32) {
    %c0_i32 = arith.constant 0 : i32
    %c0_i32_0 = arith.constant 0 : i32
    %c0_i32_1 = arith.constant 0 : i32
    return %c0_i32, %c0_i32_0 : i32, i32
  }
  func.func @transform_5(%arg0: i32) -> (i32, i32) {
    %c0_i32 = arith.constant 0 : i32
    %c0_i32_0 = arith.constant 0 : i32
    return %arg0, %c0_i32 : i32, i32
  }
}

</mosaic_0001>

<bundles_post_ra>
// kernel: tpu_custom_call.1
= control target key start
LH: loop header
LB: loop body
LE: loop exit
PB: predicated region body
PF: predicated region fallthrough
CT: control target
= control target key end

     0   :  { %10 = vsyncpa [#allocation3], 0  ;;  %s723_s0 = inlined_call_operand.hbm [shape: bf16[16,128], index: 0, kind: input, shape index: {}]   ;;  %s724_s1 = inlined_call_operand.hbm [shape: bf16[128,256], index: 1, kind: input, shape index: {}]   ;;  %s725_s2 = inlined_call_operand.vmem [shape: f32[1,256], index: 2, kind: input, shape index: {}]   ;;  %s726_s3 = inlined_call_operand.hbm [shape: bf16[256,128], index: 3, kind: input, shape index: {}]   ;;  %s727_s4 = inlined_call_operand.vmem [shape: f32[1,128], index: 4, kind: input, shape index: {}]   ;;  %s728_s5 = inlined_call_operand.hbm [shape: f32[16,128], index: 5, kind: output, shape index: {}]  }
   0x1   :  { %11 = vsyncpa [#allocation6], 0 }
   0x2   :  { %12 = vsyncpa [#allocation4], 0  ;;  %s624_s18 = smov [#allocation5]   ;;  %s530_s22 = scalar_lea.hbm %s724_s1, 2048 }
   0x3   :  { %s30_s19 = sshll.u32 %s624_s18, 4  ;;  %p531_p0 = scmp.ne.s32.totalorder %s724_s1, %s530_s22  ;;  %s31_s19 = int_to_ptr.vmem [resolvable:$true] %s30_s19 }
   0x4   :  { %p534_p1 = scmp.lt.u32.totalorder %s530_s22, %s724_s1 }
   0x6   :  { %p536_p2 = pnand %p534_p1, %p531_p0 }
   0x8   :  { %539 = shalt.err (!%p536_p2)
}
   0x9   :  { %s540_s27 = scalar_lea.vmem %s31_s19, 2048  ;;  %p545_p4 = scmp.lt.s32.totalorder %s31_s19, %s31_s19 }
   0xa   :  { %p541_p3 = scmp.ne.s32.totalorder %s31_s19, %s540_s27  ;;  %p546_p5 = scmp.lt.s32.totalorder %s540_s27, %s540_s27 }
   0xc   :  { %p547_p6 = por %p546_p5, %p545_p4 }
   0xe   :  { %p548_p7 = pnand %p547_p6, %p541_p3 }
  0x10   :  { %551 = shalt.err (!%p548_p7)
}
  0x11   :  { %s625_s28 = smov 128   ;;  %s626_s29 = smov 8  }
  0x12   :  { %36 = dma.hbm_to_vmem [thread:$0]  %s724_s1, 2048, %s31_s19, [#allocation6], %s625_s28, %s625_s28, %s626_s29  }
  0x13   :  { %s627_s7 = smov [#allocation2]   ;;  %s552_s11 = scalar_lea.hbm %s723_s0, 128 }
  0x14   :  { %s18_s8 = sshll.u32 %s627_s7, 4  ;;  %p553_p8 = scmp.ne.s32.totalorder %s723_s0, %s552_s11  ;;  %s19_s8 = int_to_ptr.vmem [resolvable:$true] %s18_s8 }
  0x15   :  { %p556_p9 = scmp.lt.u32.totalorder %s552_s11, %s723_s0 }
  0x17   :  { %p558_p10 = pnand %p556_p9, %p553_p8 }
  0x19   :  { %561 = shalt.err (!%p558_p10)
}
  0x1a   :  { %s562_s16 = scalar_lea.vmem %s19_s8, 128  ;;  %p567_p12 = scmp.lt.s32.totalorder %s19_s8, %s19_s8 }
  0x1b   :  { %p563_p11 = scmp.ne.s32.totalorder %s19_s8, %s562_s16  ;;  %p568_p13 = scmp.lt.s32.totalorder %s562_s16, %s562_s16 }
  0x1d   :  { %p569_p0 = por %p568_p13, %p567_p12 }
  0x1f   :  { %p570_p1 = pnand %p569_p0, %p563_p11 }
  0x21   :  { %573 = shalt.err (!%p570_p1)
}
  0x22   :  { %s628_s1 = smov 64   ;;  %s629_s17 = smov 4  }
  0x23   :  { %24 = dma.hbm_to_vmem [thread:$0]  %s723_s0, 128, %s19_s8, [#allocation3], %s628_s1, %s628_s1, %s629_s17  }
  0x24   :  { %s630_s20 = smov [#allocation7]   ;;  %s574_s24 = scalar_lea.hbm %s726_s3, 2048 }
  0x25   :  { %s44_s21 = sshll.u32 %s630_s20, 4  ;;  %p575_p2 = scmp.ne.s32.totalorder %s726_s3, %s574_s24  ;;  %s45_s21 = int_to_ptr.vmem [resolvable:$true] %s44_s21 }
  0x26   :  { %p578_p3 = scmp.lt.u32.totalorder %s574_s24, %s726_s3 }
  0x28   :  { %p580_p4 = pnand %p578_p3, %p575_p2 }
  0x2a   :  { %583 = shalt.err (!%p580_p4)
}
  0x2b   :  { %s584_s6 = scalar_lea.vmem %s45_s21, 2048  ;;  %p589_p6 = scmp.lt.s32.totalorder %s45_s21, %s45_s21 }
  0x2c   :  { %p585_p5 = scmp.ne.s32.totalorder %s45_s21, %s584_s6  ;;  %p590_p7 = scmp.lt.s32.totalorder %s584_s6, %s584_s6 }
  0x2e   :  { %p591_p8 = por %p590_p7, %p589_p6 }
  0x30   :  { %p592_p9 = pnand %p591_p8, %p585_p5 }
  0x32   :  { %595 = shalt.err (!%p592_p9)
}
  0x33   :  { %50 = dma.hbm_to_vmem [thread:$0]  %s726_s3, 2048, %s45_s21, [#allocation6], %s628_s1, %s628_s1, %s629_s17  }
  0x34   :  { %618 = dma.done.wait [#allocation3], 128  }
  0x35   :  { %619 = vsyncadd [#allocation3], 4294967168 }
  0x36   :  { %620 = dma.done.wait [#allocation6], 4096  }
  0x37   :  { %621 = vsyncadd [#allocation6], 4294963200  ;;  %v631_v0 = vmov 0   ;;  %v489_v1 = vld [vmem:[#allocation5 + $0x4] ss:$8 sps:$4 sm:$0xff]   ;;  %v518_v16 = vld [vmem:[#allocation7 + $0x50] sm:$0xff]   ;;  %v83_v34 = vlaneseq }
  0x38   :  { %211 = vmatprep.mubr.bf16.mxu0 %v631_v0  ;;  %v491_v2 = vld [vmem:[#allocation5] ss:$8 sps:$4 sm:$0xff]   ;;  %179 = vmatprep.subr.bf16.mxu0 %v489_v1  ;;  %v492_v3 = vld [vmem:[#allocation5 + $0x14] ss:$8 sps:$4 sm:$0xff]   ;;  %v494_v4 = vld [vmem:[#allocation5 + $0x10] ss:$8 sps:$4 sm:$0xff]  }
  0x39   :  { %180 = vmatpush1.bf16.msra.mxu0 %v491_v2  ;;  %v495_v5 = vld [vmem:[#allocation5 + $0x24] ss:$8 sps:$4 sm:$0xff]   ;;  %v497_v6 = vld [vmem:[#allocation5 + $0x20] ss:$8 sps:$4 sm:$0xff]   ;;  %v498_v7 = vld [vmem:[#allocation5 + $0x34] ss:$8 sps:$4 sm:$0xff]  }
  0x3a   :  { %181 = vmatprep.subr.bf16.mxu0 %v492_v3  ;;  %v500_v8 = vld [vmem:[#allocation5 + $0x30] ss:$8 sps:$4 sm:$0xff]   ;;  %v501_v9 = vld [vmem:[#allocation5 + $0x44] ss:$8 sps:$4 sm:$0xff]   ;;  %v503_v11 = vld [vmem:[#allocation5 + $0x40] ss:$8 sps:$4 sm:$0xff]  }
  0x3b   :  { %v514_v10 = vld [vmem:[#allocation7 + $0x40] sm:$0xff]   ;;  %v504_v13 = vld [vmem:[#allocation5 + $0x54] ss:$8 sps:$4 sm:$0xff]   ;;  %v516_v14 = vld [vmem:[#allocation7 + $0x48] sm:$0xff]   ;;  %v84_v35 = vshrl.u32 %v83_v34, 7  ;;  %s632_s10 = smov [#allocation8]  }
  0x3c   :  { %v515_v12 = vld [vmem:[#allocation7] sm:$0xff]   ;;  %458 = vmatprep.subr.bf16.mxu1 %v514_v10  ;;  %v517_v15 = vld [vmem:[#allocation7 + $0x8] sm:$0xff]   ;;  %v506_v17 = vld [vmem:[#allocation5 + $0x50] ss:$8 sps:$4 sm:$0xff]   ;;  %s411_s11 = sshll.u32 %s632_s10, 4  ;;  %s412_s11 = int_to_ptr.vmem [resolvable:$true] %s411_s11 }
  0x3d   :  { %182 = vmatpush1.bf16.msra.mxu0 %v494_v4  ;;  %459 = vmatpush3.bf16.msra.mxu1 %v515_v12  ;;  %v507_v18 = vld [vmem:[#allocation5 + $0x64] ss:$8 sps:$4 sm:$0xff]   ;;  %v519_v19 = vld [vmem:[#allocation7 + $0x10] sm:$0xff]   ;;  %v520_v20 = vld [vmem:[#allocation7 + $0x58] sm:$0xff]   ;;  %v85_v36 = vsub.s32 0, %v84_v35  ;;  %v89_v38 = vsub.s32 1, %v84_v35  ;;  %p601_p11 = scmp.lt.s32.totalorder %s412_s11, %s412_s11 }
  0x3e   :  { %183 = vmatprep.subr.bf16.mxu0 %v495_v5  ;;  %460 = vmatprep.subr.bf16.mxu1 %v516_v14  ;;  %v509_v21 = vld [vmem:[#allocation5 + $0x60] ss:$8 sps:$4 sm:$0xff]   ;;  %v510_v22 = vld [vmem:[#allocation5 + $0x74] ss:$8 sps:$4 sm:$0xff]   ;;  %v512_v25 = vld [vmem:[#allocation5 + $0x70] ss:$8 sps:$4 sm:$0xff]  }
  0x3f   :  { %v521_v23 = vld [vmem:[#allocation7 + $0x18] sm:$0xff]   ;;  %v522_v24 = vld [vmem:[#allocation7 + $0x60] sm:$0xff]   ;;  %v524_v27 = vld [vmem:[#allocation7 + $0x68] sm:$0xff]   ;;  %s596_s12 = scalar_lea.vmem %s412_s11, 256 }
  0x40   :  { %v523_v26 = vld [vmem:[#allocation7 + $0x20] sm:$0xff]   ;;  %v513_v28 = vld [vmem:[#allocation2] sm:$0xff]   ;;  %v525_v29 = vld [vmem:[#allocation7 + $0x28] sm:$0xff]   ;;  %p597_p10 = scmp.ne.s32.totalorder %s412_s11, %s596_s12  ;;  %p602_p12 = scmp.lt.s32.totalorder %s596_s12, %s596_s12 }
  0x41   :  { %184 = vmatpush1.bf16.msra.mxu0 %v497_v6  ;;  %461 = vmatpush3.bf16.msra.mxu1 %v517_v15  ;;  %v526_v30 = vld [vmem:[#allocation7 + $0x70] sm:$0xff]   ;;  %v528_v32 = vld [vmem:[#allocation7 + $0x78] sm:$0xff]  }
  0x42   :  { %185 = vmatprep.subr.bf16.mxu0 %v498_v7  ;;  %462 = vmatprep.subr.bf16.mxu1 %v518_v16  ;;  %v527_v31 = vld [vmem:[#allocation7 + $0x30] sm:$0xff]   ;;  %v529_v33 = vld [vmem:[#allocation7 + $0x38] sm:$0xff]   ;;  %p603_p13 = por %p602_p12, %p601_p11 }
  0x43   :  { %v81_v37 = vld [vmem:[%s725_s2] sm:$0x3] }
  0x44   :  { %v86_v39 = vrot.slane %v81_v37, %v85_v36  ;;  %v90_v40 = vrot.slane %v81_v37, %v89_v38  ;;  %v441_v56 = vld [vmem:[%s727_s4] ss:$0 sm:$0xff]  ;;  %p604_p0 = pnand %p603_p13, %p597_p10 }
  0x45   :  { %186 = vmatpush1.bf16.msra.mxu0 %v500_v8  ;;  %463 = vmatpush3.bf16.msra.mxu1 %v519_v19 }
  0x46   :  { %187 = vmatprep.subr.bf16.mxu0 %v501_v9  ;;  %464 = vmatprep.subr.bf16.mxu1 %v520_v20 }
  0x49   :  { %188 = vmatpush1.bf16.msra.mxu0 %v503_v11  ;;  %465 = vmatpush3.bf16.msra.mxu1 %v521_v23 }
  0x4a   :  { %189 = vmatprep.subr.bf16.mxu0 %v504_v13  ;;  %466 = vmatprep.subr.bf16.mxu1 %v522_v24 }
  0x4d   :  { %190 = vmatpush1.bf16.msra.mxu0 %v506_v17  ;;  %467 = vmatpush3.bf16.msra.mxu1 %v523_v26 }
  0x4e   :  { %191 = vmatprep.subr.bf16.mxu0 %v507_v18  ;;  %468 = vmatprep.subr.bf16.mxu1 %v524_v27 }
  0x51   :  { %192 = vmatpush1.bf16.msra.mxu0 %v509_v21  ;;  %469 = vmatpush3.bf16.msra.mxu1 %v525_v29 }
  0x52   :  { %193 = vmatprep.subr.bf16.mxu0 %v510_v22  ;;  %470 = vmatprep.subr.bf16.mxu1 %v526_v30 }
  0x55   :  { %194 = vmatpush1.bf16.msra.mxu0 %v512_v25  ;;  %471 = vmatpush3.bf16.msra.mxu1 %v527_v31 }
  0x56   :  { %472 = vmatprep.subr.bf16.mxu1 %v528_v32 }
  0x58   :  { %212 = vmatmul.mubr.bf16.vlgmr.msra.gmra.mrb[0].mxu0 %v513_v28 }
  0x59   :  { %473 = vmatpush3.bf16.msra.mxu1 %v529_v33 }
 0x12b   :  { %v213_v41 = vpop.f32.mrb[0].mxu0 }
 0x12c   :  { %v214_v42 = vadd.f32 %v213_v41, %v86_v39  ;;  %v215_v43 = vpop.f32.mrb[1].mxu0 }
 0x12d   :  { %v216_v44 = vadd.f32 %v215_v43, %v90_v40  ;;  %v217_v45 = vpop.f32.mrb[2].mxu0 }
 0x12e   :  { %v218_v46 = vadd.f32 %v217_v45, %v86_v39  ;;  %v219_v47 = vpop.f32.mrb[3].mxu0  ;;  %v222_v49 = vmax.f32 %v214_v42, 0.0 }
 0x12f   :  { %v220_v48 = vadd.f32 %v219_v47, %v90_v40  ;;  %v223_v51 = vmax.f32 %v216_v44, 0.0 }
 0x130   :  { %v224_v50 = vmax.f32 %v218_v46, 0.0 }
 0x131   :  { %v225_v52 = vmax.f32 %v220_v48, 0.0 }
 0x132   :  { %v226_v53 = vpack.c.bf16 %v224_v50, %v222_v49 }
 0x133   :  { %v227_v54 = vpack.c.bf16 %v225_v52, %v223_v51 }
 0x135   :  { %395 = vmatprep.mubr.bf16.mxu1 %v227_v54 }
 0x136   :  { %396 = vmatmul.mubr.bf16.vlgmr.msra.gmra.mrb[0].mxu1 %v226_v53 }
 0x209   :  { %v474_v55 = vpop.f32.mrb[0].mxu1 }
 0x20a   :  { %v475_v57 = vpop.f32.mrb[1].mxu1 }
 0x20b   :  { %v476_v58 = vadd.f32 %v475_v57, %v474_v55  ;;  %v477_v59 = vpop.f32.mrb[2].mxu1 }
 0x20c   :  { %v478_v60 = vpop.f32.mrb[3].mxu1 }
 0x20d   :  { %v398_v61 = vadd.f32 %v476_v58, %v441_v56  ;;  %v479_v62 = vadd.f32 %v478_v60, %v477_v59 }
 0x20f   :  { %404 = vst [vmem:[#allocation8] sm:$0xff] %v398_v61  ;;  %v401_v63 = vadd.f32 %v479_v62, %v441_v56 }
 0x211   :  { %405 = vst [vmem:[#allocation8 + $0x8] sm:$0xff] %v401_v63 }
 0x212   :  { %607 = shalt.err (!%p604_p0)
}
 0x213   :  { %s608_s14 = scalar_lea.hbm %s728_s5, 256 }
 0x214   :  { %p609_p1 = scmp.ne.s32.totalorder %s728_s5, %s608_s14  ;;  %p612_p2 = scmp.lt.u32.totalorder %s608_s14, %s728_s5 }
 0x216   :  { %p614_p3 = pnand %p612_p2, %p609_p1 }
 0x218   :  { %617 = shalt.err (!%p614_p3)
}
 0x219   :  { %417 = dma.vmem_to_hbm [thread:$0]  %s412_s11, 256, %s728_s5, [#allocation4], %s625_s28, %s625_s28, %s626_s29  }
 0x21a   :  { %622 = dma.done.wait [#allocation4], 256  }
 0x21b   :  { %623 = vsyncadd [#allocation4], 4294967040 }
 0x21c   :  { %421 = vsyncpa [#allocation3], 1 }
 0x21d   :  { %422 = vsyncpa [#allocation6], 1 }
 0x21e   :  { %423 = vsyncpa [#allocation4], 1 }

</bundles_post_ra>
